<compile_context>
chip_gen: v7x
topology: tpu7x:2x2x1
jax: 0.10.0
libtpu: 0.0.40
codegen_flags: <defaults>
</compile_context>

<pallas_src>
import functools
import math

import jax
import jax.numpy as jnp
from jax.experimental import pallas as pl
from jax.experimental.pallas import tpu as pltpu


_TB = 8  # trajectories per grid step (one sublane tile)


def _lstm_kernel(x_ref, wih_ref, whh_ref, b_ref, wout_ref, bout_ref, out_ref,
                 gx_ref, *, hidden_dim, action_max, unroll):
    """One grid step: full LSTM recurrence + output projection + clamp for TB trajectories.

    x_ref    : (seq, TB, state_dim)      f32   time-major trajectory block
    wih_ref  : (state_dim, 4*hidden)     f32   W_ih^T, g columns pre-scaled by 2
    whh_ref  : (hidden, 4*hidden)        f32   W_hh^T, g columns pre-scaled by 2
    b_ref    : (1, 4*hidden)             f32   b_ih + b_hh, g lanes pre-scaled by 2
    wout_ref : (hidden, out_pad)         f32   hidden2out weight^T, zero-padded lanes
    bout_ref : (1, out_pad)              f32   zero-padded lanes
    out_ref  : (TB, out_pad)             f32
    gx_ref   : (seq, TB, 4*hidden)       f32   VMEM scratch (hoisted input projection)
    """
    seq, tb, state_dim = x_ref.shape
    H = hidden_dim

    # Hoist the input projection + bias off the serial critical path:
    # a single (seq*TB, S) @ (S, 4H) MXU push instead of seq per-step pushes.
    x2d = x_ref[...].reshape(seq * tb, state_dim)
    gx = jnp.dot(x2d, wih_ref[...], preferred_element_type=jnp.float32) + b_ref[...]
    gx_ref[...] = gx.reshape(seq, tb, 4 * H)

    # Lane mask selecting the g-gate columns [2H, 3H) — computed once, outside loop.
    lane = jax.lax.broadcasted_iota(jnp.int32, (tb, 4 * H), 1)
    g_mask = jnp.logical_and(lane >= 2 * H, lane < 3 * H)

    def step(t, carry):
        h, c = carry                                              # (TB, H), (TB, H)
        gates = gx_ref[t] + jnp.dot(h, whh_ref[...],
                                    preferred_element_type=jnp.float32)  # (TB, 4H)
        # One full-vreg sigmoid; g lanes carry 2x the pre-activation, so
        # tanh(g_pre) == 2*sigmoid(2*g_pre) - 1 is recovered with a cheap select.
        s = jax.nn.sigmoid(gates)
        act = jnp.where(g_mask, 2.0 * s - 1.0, s)
        i = act[:, 0:H]
        f = act[:, H:2 * H]
        g = act[:, 2 * H:3 * H]
        o = act[:, 3 * H:4 * H]
        c_new = f * c + i * g
        h_new = o * jnp.tanh(c_new)
        return (h_new, c_new)

    h0 = jnp.zeros((tb, H), jnp.float32)
    c0 = jnp.zeros((tb, H), jnp.float32)
    h, _ = jax.lax.fori_loop(0, seq, step, (h0, c0), unroll=unroll)

    out = jnp.dot(h, wout_ref[...], preferred_element_type=jnp.float32) + bout_ref[...]
    out_ref[...] = jnp.clip(out, -action_max, action_max).astype(out_ref.dtype)


def _lstm_pallas(x, prepared, *, hidden_dim, action_max):
    """x: (seq, B, state_dim) with B a multiple of _TB. Returns (B, out_pad)."""
    seq, B, state_dim = x.shape
    wih_k, whh_k, b_k, wout_p, bout_p = prepared
    H = hidden_dim
    out_pad = wout_p.shape[1]
    tb = _TB
    assert B % tb == 0
    nb = B // tb

    kernel = functools.partial(_lstm_kernel, hidden_dim=H,
                               action_max=float(action_max),
                               unroll=min(int(seq), 8))

    grid_spec = pltpu.PrefetchScalarGridSpec(
        num_scalar_prefetch=0,
        grid=(nb,),
        in_specs=[
            pl.BlockSpec((seq, tb, state_dim), lambda i: (0, i, 0)),
            pl.BlockSpec((state_dim, 4 * H), lambda i: (0, 0)),
            pl.BlockSpec((H, 4 * H), lambda i: (0, 0)),
            pl.BlockSpec((1, 4 * H), lambda i: (0, 0)),
            pl.BlockSpec((H, out_pad), lambda i: (0, 0)),
            pl.BlockSpec((1, out_pad), lambda i: (0, 0)),
        ],
        out_specs=pl.BlockSpec((tb, out_pad), lambda i: (i, 0)),
        scratch_shapes=[pltpu.VMEM((seq, tb, 4 * H), jnp.float32)],
    )

    return pl.pallas_call(
        kernel,
        out_shape=jax.ShapeDtypeStruct((B, out_pad), jnp.float32),
        grid_spec=grid_spec,
        compiler_params=pltpu.CompilerParams(
            dimension_semantics=("parallel",)),   # shards blocks across v7x's 2 TCs
    )(x, wih_k, whh_k, b_k, wout_p, bout_p)


def prepare_params(params, *, hidden_dim, pred_length, action_dim):
    """One-time (load-time) weight folding/padding for the kernel.

    Folds the tanh->sigmoid trick into the weights (g-gate columns [2H,3H) of
    W_ih^T / W_hh^T / bias scaled by 2) and zero-pads the output projection to
    a lane-dense 128-multiple slab so the kernel does an unmasked store.
    """
    wih_t, whh_t, b, wout_t, bout = params
    H = hidden_dim
    out_dim = pred_length * action_dim
    out_pad = max(128, ((out_dim + 127) // 128) * 128)

    g_scale = jnp.ones((4 * H,), jnp.float32).at[2 * H:3 * H].set(2.0)
    wih_k = (wih_t * g_scale[None, :]).astype(jnp.float32)
    whh_k = (whh_t * g_scale[None, :]).astype(jnp.float32)
    b_k = (b * g_scale[None, :]).astype(jnp.float32)
    wout_p = jnp.zeros((H, out_pad), jnp.float32).at[:, :out_dim].set(wout_t)
    bout_p = jnp.zeros((1, out_pad), jnp.float32).at[:, :out_dim].set(bout)
    return (wih_k, whh_k, b_k, wout_p, bout_p)


def lstm_policy_forward(trajectory, prepared, *, hidden_dim, pred_length,
                        action_dim, action_max=1.0):
    """Deterministic forward for a single unbatched trajectory (module semantics).

    Returns (action[pred_length, action_dim], None)."""
    seq, state_dim = trajectory.shape
    # Replicate across the 8-wide sublane tile (same MXU push cost as M=1);
    # only row 0 of the output block is read.
    x = jnp.broadcast_to(trajectory[:, None, :], (seq, _TB, state_dim))
    out = _lstm_pallas(x, prepared, hidden_dim=hidden_dim, action_max=action_max)
    out_dim = pred_length * action_dim
    action = out[0, :out_dim].reshape(pred_length, action_dim)
    return action, None


def lstm_policy_forward_batched(trajectories, prepared, *, hidden_dim,
                                pred_length, action_dim, action_max=1.0):
    """Batched forward: trajectories (seq, B, state_dim) -> (B, pred_length, action_dim)."""
    seq, B, state_dim = trajectories.shape
    B_pad = ((B + _TB - 1) // _TB) * _TB
    x = trajectories
    if B_pad != B:
        x = jnp.concatenate(
            [x, jnp.zeros((seq, B_pad - B, state_dim), x.dtype)], axis=1)
    out = _lstm_pallas(x, prepared, hidden_dim=hidden_dim, action_max=action_max)
    out_dim = pred_length * action_dim
    actions = out[:B, :out_dim].reshape(B, pred_length, action_dim)
    return actions, None


def _reference_forward(trajectory, params, hidden_dim, pred_length, action_dim,
                       action_max):
    """Pure-JAX reference (original, unfolded params) for correctness checking."""
    wih_t, whh_t, b, wout_t, bout = params
    H = hidden_dim
    h = jnp.zeros((1, H), jnp.float32)
    c = jnp.zeros((1, H), jnp.float32)
    for t in range(trajectory.shape[0]):
        gates = trajectory[t:t + 1] @ wih_t + h @ whh_t + b
        i = jax.nn.sigmoid(gates[:, 0:H])
        f = jax.nn.sigmoid(gates[:, H:2 * H])
        g = jnp.tanh(gates[:, 2 * H:3 * H])
        o = jax.nn.sigmoid(gates[:, 3 * H:4 * H])
        c = f * c + i * g
        h = o * jnp.tanh(c)
    out = h @ wout_t + bout
    out = jnp.clip(out, -action_max, action_max)
    return out.reshape(pred_length, action_dim)


def init_params(key, state_dim, hidden_dim, pred_length, action_dim):
    """Deterministic init mimicking PyTorch's U(-1/sqrt(H), 1/sqrt(H))."""
    k = 1.0 / math.sqrt(hidden_dim)
    out_dim = pred_length * action_dim
    keys = jax.random.split(key, 7)
    # PyTorch stores weight_ih as (4H, state_dim), weight_hh as (4H, H); we keep
    # the transposed layout for the kernel directly. Gate order: (i, f, g, o).
    wih_t = jax.random.uniform(keys[0], (state_dim, 4 * hidden_dim), jnp.float32, -k, k)
    whh_t = jax.random.uniform(keys[1], (hidden_dim, 4 * hidden_dim), jnp.float32, -k, k)
    b_ih = jax.random.uniform(keys[2], (1, 4 * hidden_dim), jnp.float32, -k, k)
    b_hh = jax.random.uniform(keys[3], (1, 4 * hidden_dim), jnp.float32, -k, k)
    b = b_ih + b_hh
    wout_t = jax.random.uniform(keys[4], (hidden_dim, out_dim), jnp.float32, -k, k)
    bout = jax.random.uniform(keys[5], (1, out_dim), jnp.float32, -k, k)
    return wih_t, whh_t, b, wout_t, bout


if __name__ == "__main__":
    # Small, forward-consistent shapes (batch_first=False => time-major).
    seq_len = 8
    state_dim = 4
    hidden_dim = 32
    pred_length = 4
    action_dim = 2
    action_max = 1.0

    key = jax.random.PRNGKey(0)
    k_x, k_p, k_b = jax.random.split(key, 3)
    trajectory = jax.random.normal(k_x, (seq_len, state_dim), jnp.float32)
    params = init_params(k_p, state_dim, hidden_dim, pred_length, action_dim)

    # One-time weight folding/padding (done at load time, not per call).
    prepared = prepare_params(params, hidden_dim=hidden_dim,
                              pred_length=pred_length, action_dim=action_dim)
    prepared = tuple(jax.block_until_ready(p) for p in prepared)

    # 1) Unbatched trajectory — module's default forward semantics.
    action, log_prob = lstm_policy_forward(
        trajectory, prepared, hidden_dim=hidden_dim, pred_length=pred_length,
        action_dim=action_dim, action_max=action_max)
    action = jax.block_until_ready(action)

    ref = _reference_forward(trajectory, params, hidden_dim, pred_length,
                             action_dim, action_max)
    assert action.shape == (pred_length, action_dim)
    assert log_prob is None
    assert jnp.allclose(action, ref, atol=1e-5, rtol=1e-5), (action, ref)

    # 2) Batched trajectories — one gridded pallas_call, grid=(B//8,),
    #    parallel across TensorCores on v7x.
    B = 16
    trajs = jax.random.normal(k_b, (seq_len, B, state_dim), jnp.float32)
    actions, _ = lstm_policy_forward_batched(
        trajs, prepared, hidden_dim=hidden_dim, pred_length=pred_length,
        action_dim=action_dim, action_max=action_max)
    actions = jax.block_until_ready(actions)
    assert actions.shape == (B, pred_length, action_dim)
    for bi in range(B):
        ref_b = _reference_forward(trajs[:, bi, :], params, hidden_dim,
                                   pred_length, action_dim, action_max)
        assert jnp.allclose(actions[bi], ref_b, atol=1e-5, rtol=1e-5), bi

    print("KERNEL_OK")
</pallas_src>

<mosaic_0001>
module attributes {stable_mosaic.version = 11 : i64} {
  func.func @_lstm_kernel(%arg0: i32, %arg1: memref<8x8x4xf32, #tpu.memory_space<vmem>>, %arg2: memref<4x128xf32, #tpu.memory_space<vmem>>, %arg3: memref<32x128xf32, #tpu.memory_space<vmem>>, %arg4: memref<1x128xf32, #tpu.memory_space<vmem>>, %arg5: memref<32x128xf32, #tpu.memory_space<vmem>>, %arg6: memref<1x128xf32, #tpu.memory_space<vmem>>, %arg7: memref<8x128xf32, #tpu.memory_space<vmem>>, %arg8: memref<8x8x128xf32, #tpu.memory_space<vmem>>) attributes {dimension_semantics = [#tpu.dimension_semantics<parallel>], iteration_bounds = array<i64: 1>, scalar_prefetch = 0 : i64, scratch_operands = 1 : i64, tpu.core_type = #tpu.core_type<tc>, window_params = [{transform_indices = @transform_0, window_bounds = array<i64: 8, 8, 4>}, {pipeline_mode = #tpu.pipeline_mode<synchronous>, transform_indices = @transform_1, window_bounds = array<i64: 4, 128>}, {pipeline_mode = #tpu.pipeline_mode<synchronous>, transform_indices = @transform_2, window_bounds = array<i64: 32, 128>}, {pipeline_mode = #tpu.pipeline_mode<synchronous>, transform_indices = @transform_3, window_bounds = array<i64: 1, 128>}, {pipeline_mode = #tpu.pipeline_mode<synchronous>, transform_indices = @transform_4, window_bounds = array<i64: 32, 128>}, {pipeline_mode = #tpu.pipeline_mode<synchronous>, transform_indices = @transform_5, window_bounds = array<i64: 1, 128>}, {transform_indices = @transform_6, window_bounds = array<i64: 8, 128>}]} {
    %c0 = arith.constant 0 : index
    %c0_0 = arith.constant 0 : index
    %c0_1 = arith.constant 0 : index
    %0 = vector.load %arg1[%c0, %c0_0, %c0_1] : memref<8x8x4xf32, #tpu.memory_space<vmem>>, vector<8x8x4xf32>
    %1 = vector.shape_cast %0 : vector<8x8x4xf32> to vector<64x4xf32>
    %c0_2 = arith.constant 0 : index
    %c0_3 = arith.constant 0 : index
    %2 = vector.load %arg2[%c0_2, %c0_3] : memref<4x128xf32, #tpu.memory_space<vmem>>, vector<4x128xf32>
    %cst = arith.constant dense<0.000000e+00> : vector<64x128xf32>
    %3 = tpu.matmul %1, %2, %cst {dimension_numbers = #tpu.dot_dimension_numbers<[1], [0], [0], [1], [0, 0, 1, 1], [], []>} : vector<64x4xf32>, vector<4x128xf32>, vector<64x128xf32> -> vector<64x128xf32>
    %c0_4 = arith.constant 0 : index
    %c0_5 = arith.constant 0 : index
    %4 = vector.load %arg4[%c0_4, %c0_5] : memref<1x128xf32, #tpu.memory_space<vmem>>, vector<1x128xf32>
    %5 = vector.broadcast %4 : vector<1x128xf32> to vector<64x128xf32>
    %6 = arith.addf %3, %5 : vector<64x128xf32>
    %7 = vector.shape_cast %6 : vector<64x128xf32> to vector<8x8x128xf32>
    %c0_6 = arith.constant 0 : index
    %c0_7 = arith.constant 0 : index
    %c0_8 = arith.constant 0 : index
    %8 = vector.load %arg8[%c0_6, %c0_7, %c0_8] : memref<8x8x128xf32, #tpu.memory_space<vmem>>, vector<8x8x128xf32>
    tpu.vector_store %arg8[%c0_6, %c0_7, %c0_8], %7 {strides = array<i32>} : memref<8x8x128xf32, #tpu.memory_space<vmem>>, vector<8x8x128xf32>,
    %9 = tpu.iota {dimensions = array<i32: 1>} : vector<8x128xi32>
    %c64_i32 = arith.constant 64 : i32
    %10 = vector.broadcast %c64_i32 : i32 to vector<8x128xi32>
    %11 = arith.cmpi sge, %9, %10 : vector<8x128xi32>
    %c96_i32 = arith.constant 96 : i32
    %12 = vector.broadcast %c96_i32 : i32 to vector<8x128xi32>
    %13 = arith.cmpi slt, %9, %12 : vector<8x128xi32>
    %14 = arith.andi %11, %13 : vector<8x128xi1>
    %cst_9 = arith.constant 0.000000e+00 : f32
    %15 = vector.broadcast %cst_9 : f32 to vector<8x32xf32>
    %cst_10 = arith.constant 0.000000e+00 : f32
    %16 = vector.broadcast %cst_10 : f32 to vector<8x32xf32>
    %c0_i32 = arith.constant 0 : i32
    %17 = arith.index_cast %c0_i32 : i32 to index
    %c0_11 = arith.constant 0 : index
    %c0_12 = arith.constant 0 : index
    %18 = vector.load %arg8[%17, %c0_11, %c0_12] : memref<8x8x128xf32, #tpu.memory_space<vmem>>, vector<1x8x128xf32>
    %19 = vector.shape_cast %18 : vector<1x8x128xf32> to vector<8x128xf32>
    %c0_13 = arith.constant 0 : index
    %c0_14 = arith.constant 0 : index
    %20 = vector.load %arg3[%c0_13, %c0_14] : memref<32x128xf32, #tpu.memory_space<vmem>>, vector<32x128xf32>
    %cst_15 = arith.constant dense<0.000000e+00> : vector<8x128xf32>
    %21 = tpu.matmul %15, %20, %cst_15 {dimension_numbers = #tpu.dot_dimension_numbers<[1], [0], [0], [1], [0, 0, 1, 1], [], []>} : vector<8x32xf32>, vector<32x128xf32>, vector<8x128xf32> -> vector<8x128xf32>
    %22 = arith.addf %19, %21 : vector<8x128xf32>
    %23 = arith.negf %22 : vector<8x128xf32>
    %24 = math.exp %23 : vector<8x128xf32>
    %cst_16 = arith.constant 1.000000e+00 : f32
    %25 = vector.broadcast %cst_16 : f32 to vector<8x128xf32>
    %26 = arith.addf %25, %24 : vector<8x128xf32>
    %27 = arith.divf %25, %26 : vector<8x128xf32>
    %cst_17 = arith.constant 2.000000e+00 : f32
    %28 = vector.broadcast %cst_17 : f32 to vector<8x128xf32>
    %29 = arith.mulf %28, %27 : vector<8x128xf32>
    %cst_18 = arith.constant 1.000000e+00 : f32
    %30 = vector.broadcast %cst_18 : f32 to vector<8x128xf32>
    %31 = arith.subf %29, %30 : vector<8x128xf32>
    %32 = arith.select %14, %31, %27 : vector<8x128xi1>, vector<8x128xf32>
    %33 = vector.extract_strided_slice %32 {offsets = [0, 0], sizes = [8, 32], strides = [1, 1]} : vector<8x128xf32> to vector<8x32xf32>
    %34 = vector.extract_strided_slice %32 {offsets = [0, 32], sizes = [8, 32], strides = [1, 1]} : vector<8x128xf32> to vector<8x32xf32>
    %35 = vector.extract_strided_slice %32 {offsets = [0, 64], sizes = [8, 32], strides = [1, 1]} : vector<8x128xf32> to vector<8x32xf32>
    %36 = vector.extract_strided_slice %32 {offsets = [0, 96], sizes = [8, 32], strides = [1, 1]} : vector<8x128xf32> to vector<8x32xf32>
    %37 = arith.mulf %34, %16 : vector<8x32xf32>
    %38 = arith.mulf %33, %35 : vector<8x32xf32>
    %39 = arith.addf %37, %38 : vector<8x32xf32>
    %40 = math.tanh %39 : vector<8x32xf32>
    %41 = arith.mulf %36, %40 : vector<8x32xf32>
    %c1_i32 = arith.constant 1 : i32
    %42 = arith.index_cast %c1_i32 : i32 to index
    %c0_19 = arith.constant 0 : index
    %c0_20 = arith.constant 0 : index
    %43 = vector.load %arg8[%42, %c0_19, %c0_20] : memref<8x8x128xf32, #tpu.memory_space<vmem>>, vector<1x8x128xf32>
    %44 = vector.shape_cast %43 : vector<1x8x128xf32> to vector<8x128xf32>
    %c0_21 = arith.constant 0 : index
    %c0_22 = arith.constant 0 : index
    %45 = vector.load %arg3[%c0_21, %c0_22] : memref<32x128xf32, #tpu.memory_space<vmem>>, vector<32x128xf32>
    %cst_23 = arith.constant dense<0.000000e+00> : vector<8x128xf32>
    %46 = tpu.matmul %41, %45, %cst_23 {dimension_numbers = #tpu.dot_dimension_numbers<[1], [0], [0], [1], [0, 0, 1, 1], [], []>} : vector<8x32xf32>, vector<32x128xf32>, vector<8x128xf32> -> vector<8x128xf32>
    %47 = arith.addf %44, %46 : vector<8x128xf32>
    %48 = arith.negf %47 : vector<8x128xf32>
    %49 = math.exp %48 : vector<8x128xf32>
    %cst_24 = arith.constant 1.000000e+00 : f32
    %50 = vector.broadcast %cst_24 : f32 to vector<8x128xf32>
    %51 = arith.addf %50, %49 : vector<8x128xf32>
    %52 = arith.divf %50, %51 : vector<8x128xf32>
    %cst_25 = arith.constant 2.000000e+00 : f32
    %53 = vector.broadcast %cst_25 : f32 to vector<8x128xf32>
    %54 = arith.mulf %53, %52 : vector<8x128xf32>
    %cst_26 = arith.constant 1.000000e+00 : f32
    %55 = vector.broadcast %cst_26 : f32 to vector<8x128xf32>
    %56 = arith.subf %54, %55 : vector<8x128xf32>
    %57 = arith.select %14, %56, %52 : vector<8x128xi1>, vector<8x128xf32>
    %58 = vector.extract_strided_slice %57 {offsets = [0, 0], sizes = [8, 32], strides = [1, 1]} : vector<8x128xf32> to vector<8x32xf32>
    %59 = vector.extract_strided_slice %57 {offsets = [0, 32], sizes = [8, 32], strides = [1, 1]} : vector<8x128xf32> to vector<8x32xf32>
    %60 = vector.extract_strided_slice %57 {offsets = [0, 64], sizes = [8, 32], strides = [1, 1]} : vector<8x128xf32> to vector<8x32xf32>
    %61 = vector.extract_strided_slice %57 {offsets = [0, 96], sizes = [8, 32], strides = [1, 1]} : vector<8x128xf32> to vector<8x32xf32>
    %62 = arith.mulf %59, %39 : vector<8x32xf32>
    %63 = arith.mulf %58, %60 : vector<8x32xf32>
    %64 = arith.addf %62, %63 : vector<8x32xf32>
    %65 = math.tanh %64 : vector<8x32xf32>
    %66 = arith.mulf %61, %65 : vector<8x32xf32>
    %c2_i32 = arith.constant 2 : i32
    %67 = arith.index_cast %c2_i32 : i32 to index
    %c0_27 = arith.constant 0 : index
    %c0_28 = arith.constant 0 : index
    %68 = vector.load %arg8[%67, %c0_27, %c0_28] : memref<8x8x128xf32, #tpu.memory_space<vmem>>, vector<1x8x128xf32>
    %69 = vector.shape_cast %68 : vector<1x8x128xf32> to vector<8x128xf32>
    %c0_29 = arith.constant 0 : index
    %c0_30 = arith.constant 0 : index
    %70 = vector.load %arg3[%c0_29, %c0_30] : memref<32x128xf32, #tpu.memory_space<vmem>>, vector<32x128xf32>
    %cst_31 = arith.constant dense<0.000000e+00> : vector<8x128xf32>
    %71 = tpu.matmul %66, %70, %cst_31 {dimension_numbers = #tpu.dot_dimension_numbers<[1], [0], [0], [1], [0, 0, 1, 1], [], []>} : vector<8x32xf32>, vector<32x128xf32>, vector<8x128xf32> -> vector<8x128xf32>
    %72 = arith.addf %69, %71 : vector<8x128xf32>
    %73 = arith.negf %72 : vector<8x128xf32>
    %74 = math.exp %73 : vector<8x128xf32>
    %cst_32 = arith.constant 1.000000e+00 : f32
    %75 = vector.broadcast %cst_32 : f32 to vector<8x128xf32>
    %76 = arith.addf %75, %74 : vector<8x128xf32>
    %77 = arith.divf %75, %76 : vector<8x128xf32>
    %cst_33 = arith.constant 2.000000e+00 : f32
    %78 = vector.broadcast %cst_33 : f32 to vector<8x128xf32>
    %79 = arith.mulf %78, %77 : vector<8x128xf32>
    %cst_34 = arith.constant 1.000000e+00 : f32
    %80 = vector.broadcast %cst_34 : f32 to vector<8x128xf32>
    %81 = arith.subf %79, %80 : vector<8x128xf32>
    %82 = arith.select %14, %81, %77 : vector<8x128xi1>, vector<8x128xf32>
    %83 = vector.extract_strided_slice %82 {offsets = [0, 0], sizes = [8, 32], strides = [1, 1]} : vector<8x128xf32> to vector<8x32xf32>
    %84 = vector.extract_strided_slice %82 {offsets = [0, 32], sizes = [8, 32], strides = [1, 1]} : vector<8x128xf32> to vector<8x32xf32>
    %85 = vector.extract_strided_slice %82 {offsets = [0, 64], sizes = [8, 32], strides = [1, 1]} : vector<8x128xf32> to vector<8x32xf32>
    %86 = vector.extract_strided_slice %82 {offsets = [0, 96], sizes = [8, 32], strides = [1, 1]} : vector<8x128xf32> to vector<8x32xf32>
    %87 = arith.mulf %84, %64 : vector<8x32xf32>
    %88 = arith.mulf %83, %85 : vector<8x32xf32>
    %89 = arith.addf %87, %88 : vector<8x32xf32>
    %90 = math.tanh %89 : vector<8x32xf32>
    %91 = arith.mulf %86, %90 : vector<8x32xf32>
    %c3_i32 = arith.constant 3 : i32
    %92 = arith.index_cast %c3_i32 : i32 to index
    %c0_35 = arith.constant 0 : index
    %c0_36 = arith.constant 0 : index
    %93 = vector.load %arg8[%92, %c0_35, %c0_36] : memref<8x8x128xf32, #tpu.memory_space<vmem>>, vector<1x8x128xf32>
    %94 = vector.shape_cast %93 : vector<1x8x128xf32> to vector<8x128xf32>
    %c0_37 = arith.constant 0 : index
    %c0_38 = arith.constant 0 : index
    %95 = vector.load %arg3[%c0_37, %c0_38] : memref<32x128xf32, #tpu.memory_space<vmem>>, vector<32x128xf32>
    %cst_39 = arith.constant dense<0.000000e+00> : vector<8x128xf32>
    %96 = tpu.matmul %91, %95, %cst_39 {dimension_numbers = #tpu.dot_dimension_numbers<[1], [0], [0], [1], [0, 0, 1, 1], [], []>} : vector<8x32xf32>, vector<32x128xf32>, vector<8x128xf32> -> vector<8x128xf32>
    %97 = arith.addf %94, %96 : vector<8x128xf32>
    %98 = arith.negf %97 : vector<8x128xf32>
    %99 = math.exp %98 : vector<8x128xf32>
    %cst_40 = arith.constant 1.000000e+00 : f32
    %100 = vector.broadcast %cst_40 : f32 to vector<8x128xf32>
    %101 = arith.addf %100, %99 : vector<8x128xf32>
    %102 = arith.divf %100, %101 : vector<8x128xf32>
    %cst_41 = arith.constant 2.000000e+00 : f32
    %103 = vector.broadcast %cst_41 : f32 to vector<8x128xf32>
    %104 = arith.mulf %103, %102 : vector<8x128xf32>
    %cst_42 = arith.constant 1.000000e+00 : f32
    %105 = vector.broadcast %cst_42 : f32 to vector<8x128xf32>
    %106 = arith.subf %104, %105 : vector<8x128xf32>
    %107 = arith.select %14, %106, %102 : vector<8x128xi1>, vector<8x128xf32>
    %108 = vector.extract_strided_slice %107 {offsets = [0, 0], sizes = [8, 32], strides = [1, 1]} : vector<8x128xf32> to vector<8x32xf32>
    %109 = vector.extract_strided_slice %107 {offsets = [0, 32], sizes = [8, 32], strides = [1, 1]} : vector<8x128xf32> to vector<8x32xf32>
    %110 = vector.extract_strided_slice %107 {offsets = [0, 64], sizes = [8, 32], strides = [1, 1]} : vector<8x128xf32> to vector<8x32xf32>
    %111 = vector.extract_strided_slice %107 {offsets = [0, 96], sizes = [8, 32], strides = [1, 1]} : vector<8x128xf32> to vector<8x32xf32>
    %112 = arith.mulf %109, %89 : vector<8x32xf32>
    %113 = arith.mulf %108, %110 : vector<8x32xf32>
    %114 = arith.addf %112, %113 : vector<8x32xf32>
    %115 = math.tanh %114 : vector<8x32xf32>
    %116 = arith.mulf %111, %115 : vector<8x32xf32>
    %c4_i32 = arith.constant 4 : i32
    %117 = arith.index_cast %c4_i32 : i32 to index
    %c0_43 = arith.constant 0 : index
    %c0_44 = arith.constant 0 : index
    %118 = vector.load %arg8[%117, %c0_43, %c0_44] : memref<8x8x128xf32, #tpu.memory_space<vmem>>, vector<1x8x128xf32>
    %119 = vector.shape_cast %118 : vector<1x8x128xf32> to vector<8x128xf32>
    %c0_45 = arith.constant 0 : index
    %c0_46 = arith.constant 0 : index
    %120 = vector.load %arg3[%c0_45, %c0_46] : memref<32x128xf32, #tpu.memory_space<vmem>>, vector<32x128xf32>
    %cst_47 = arith.constant dense<0.000000e+00> : vector<8x128xf32>
    %121 = tpu.matmul %116, %120, %cst_47 {dimension_numbers = #tpu.dot_dimension_numbers<[1], [0], [0], [1], [0, 0, 1, 1], [], []>} : vector<8x32xf32>, vector<32x128xf32>, vector<8x128xf32> -> vector<8x128xf32>
    %122 = arith.addf %119, %121 : vector<8x128xf32>
    %123 = arith.negf %122 : vector<8x128xf32>
    %124 = math.exp %123 : vector<8x128xf32>
    %cst_48 = arith.constant 1.000000e+00 : f32
    %125 = vector.broadcast %cst_48 : f32 to vector<8x128xf32>
    %126 = arith.addf %125, %124 : vector<8x128xf32>
    %127 = arith.divf %125, %126 : vector<8x128xf32>
    %cst_49 = arith.constant 2.000000e+00 : f32
    %128 = vector.broadcast %cst_49 : f32 to vector<8x128xf32>
    %129 = arith.mulf %128, %127 : vector<8x128xf32>
    %cst_50 = arith.constant 1.000000e+00 : f32
    %130 = vector.broadcast %cst_50 : f32 to vector<8x128xf32>
    %131 = arith.subf %129, %130 : vector<8x128xf32>
    %132 = arith.select %14, %131, %127 : vector<8x128xi1>, vector<8x128xf32>
    %133 = vector.extract_strided_slice %132 {offsets = [0, 0], sizes = [8, 32], strides = [1, 1]} : vector<8x128xf32> to vector<8x32xf32>
    %134 = vector.extract_strided_slice %132 {offsets = [0, 32], sizes = [8, 32], strides = [1, 1]} : vector<8x128xf32> to vector<8x32xf32>
    %135 = vector.extract_strided_slice %132 {offsets = [0, 64], sizes = [8, 32], strides = [1, 1]} : vector<8x128xf32> to vector<8x32xf32>
    %136 = vector.extract_strided_slice %132 {offsets = [0, 96], sizes = [8, 32], strides = [1, 1]} : vector<8x128xf32> to vector<8x32xf32>
    %137 = arith.mulf %134, %114 : vector<8x32xf32>
    %138 = arith.mulf %133, %135 : vector<8x32xf32>
    %139 = arith.addf %137, %138 : vector<8x32xf32>
    %140 = math.tanh %139 : vector<8x32xf32>
    %141 = arith.mulf %136, %140 : vector<8x32xf32>
    %c5_i32 = arith.constant 5 : i32
    %142 = arith.index_cast %c5_i32 : i32 to index
    %c0_51 = arith.constant 0 : index
    %c0_52 = arith.constant 0 : index
    %143 = vector.load %arg8[%142, %c0_51, %c0_52] : memref<8x8x128xf32, #tpu.memory_space<vmem>>, vector<1x8x128xf32>
    %144 = vector.shape_cast %143 : vector<1x8x128xf32> to vector<8x128xf32>
    %c0_53 = arith.constant 0 : index
    %c0_54 = arith.constant 0 : index
    %145 = vector.load %arg3[%c0_53, %c0_54] : memref<32x128xf32, #tpu.memory_space<vmem>>, vector<32x128xf32>
    %cst_55 = arith.constant dense<0.000000e+00> : vector<8x128xf32>
    %146 = tpu.matmul %141, %145, %cst_55 {dimension_numbers = #tpu.dot_dimension_numbers<[1], [0], [0], [1], [0, 0, 1, 1], [], []>} : vector<8x32xf32>, vector<32x128xf32>, vector<8x128xf32> -> vector<8x128xf32>
    %147 = arith.addf %144, %146 : vector<8x128xf32>
    %148 = arith.negf %147 : vector<8x128xf32>
    %149 = math.exp %148 : vector<8x128xf32>
    %cst_56 = arith.constant 1.000000e+00 : f32
    %150 = vector.broadcast %cst_56 : f32 to vector<8x128xf32>
    %151 = arith.addf %150, %149 : vector<8x128xf32>
    %152 = arith.divf %150, %151 : vector<8x128xf32>
    %cst_57 = arith.constant 2.000000e+00 : f32
    %153 = vector.broadcast %cst_57 : f32 to vector<8x128xf32>
    %154 = arith.mulf %153, %152 : vector<8x128xf32>
    %cst_58 = arith.constant 1.000000e+00 : f32
    %155 = vector.broadcast %cst_58 : f32 to vector<8x128xf32>
    %156 = arith.subf %154, %155 : vector<8x128xf32>
    %157 = arith.select %14, %156, %152 : vector<8x128xi1>, vector<8x128xf32>
    %158 = vector.extract_strided_slice %157 {offsets = [0, 0], sizes = [8, 32], strides = [1, 1]} : vector<8x128xf32> to vector<8x32xf32>
    %159 = vector.extract_strided_slice %157 {offsets = [0, 32], sizes = [8, 32], strides = [1, 1]} : vector<8x128xf32> to vector<8x32xf32>
    %160 = vector.extract_strided_slice %157 {offsets = [0, 64], sizes = [8, 32], strides = [1, 1]} : vector<8x128xf32> to vector<8x32xf32>
    %161 = vector.extract_strided_slice %157 {offsets = [0, 96], sizes = [8, 32], strides = [1, 1]} : vector<8x128xf32> to vector<8x32xf32>
    %162 = arith.mulf %159, %139 : vector<8x32xf32>
    %163 = arith.mulf %158, %160 : vector<8x32xf32>
    %164 = arith.addf %162, %163 : vector<8x32xf32>
    %165 = math.tanh %164 : vector<8x32xf32>
    %166 = arith.mulf %161, %165 : vector<8x32xf32>
    %c6_i32 = arith.constant 6 : i32
    %167 = arith.index_cast %c6_i32 : i32 to index
    %c0_59 = arith.constant 0 : index
    %c0_60 = arith.constant 0 : index
    %168 = vector.load %arg8[%167, %c0_59, %c0_60] : memref<8x8x128xf32, #tpu.memory_space<vmem>>, vector<1x8x128xf32>
    %169 = vector.shape_cast %168 : vector<1x8x128xf32> to vector<8x128xf32>
    %c0_61 = arith.constant 0 : index
    %c0_62 = arith.constant 0 : index
    %170 = vector.load %arg3[%c0_61, %c0_62] : memref<32x128xf32, #tpu.memory_space<vmem>>, vector<32x128xf32>
    %cst_63 = arith.constant dense<0.000000e+00> : vector<8x128xf32>
    %171 = tpu.matmul %166, %170, %cst_63 {dimension_numbers = #tpu.dot_dimension_numbers<[1], [0], [0], [1], [0, 0, 1, 1], [], []>} : vector<8x32xf32>, vector<32x128xf32>, vector<8x128xf32> -> vector<8x128xf32>
    %172 = arith.addf %169, %171 : vector<8x128xf32>
    %173 = arith.negf %172 : vector<8x128xf32>
    %174 = math.exp %173 : vector<8x128xf32>
    %cst_64 = arith.constant 1.000000e+00 : f32
    %175 = vector.broadcast %cst_64 : f32 to vector<8x128xf32>
    %176 = arith.addf %175, %174 : vector<8x128xf32>
    %177 = arith.divf %175, %176 : vector<8x128xf32>
    %cst_65 = arith.constant 2.000000e+00 : f32
    %178 = vector.broadcast %cst_65 : f32 to vector<8x128xf32>
    %179 = arith.mulf %178, %177 : vector<8x128xf32>
    %cst_66 = arith.constant 1.000000e+00 : f32
    %180 = vector.broadcast %cst_66 : f32 to vector<8x128xf32>
    %181 = arith.subf %179, %180 : vector<8x128xf32>
    %182 = arith.select %14, %181, %177 : vector<8x128xi1>, vector<8x128xf32>
    %183 = vector.extract_strided_slice %182 {offsets = [0, 0], sizes = [8, 32], strides = [1, 1]} : vector<8x128xf32> to vector<8x32xf32>
    %184 = vector.extract_strided_slice %182 {offsets = [0, 32], sizes = [8, 32], strides = [1, 1]} : vector<8x128xf32> to vector<8x32xf32>
    %185 = vector.extract_strided_slice %182 {offsets = [0, 64], sizes = [8, 32], strides = [1, 1]} : vector<8x128xf32> to vector<8x32xf32>
    %186 = vector.extract_strided_slice %182 {offsets = [0, 96], sizes = [8, 32], strides = [1, 1]} : vector<8x128xf32> to vector<8x32xf32>
    %187 = arith.mulf %184, %164 : vector<8x32xf32>
    %188 = arith.mulf %183, %185 : vector<8x32xf32>
    %189 = arith.addf %187, %188 : vector<8x32xf32>
    %190 = math.tanh %189 : vector<8x32xf32>
    %191 = arith.mulf %186, %190 : vector<8x32xf32>
    %c7_i32 = arith.constant 7 : i32
    %192 = arith.index_cast %c7_i32 : i32 to index
    %c0_67 = arith.constant 0 : index
    %c0_68 = arith.constant 0 : index
    %193 = vector.load %arg8[%192, %c0_67, %c0_68] : memref<8x8x128xf32, #tpu.memory_space<vmem>>, vector<1x8x128xf32>
    %194 = vector.shape_cast %193 : vector<1x8x128xf32> to vector<8x128xf32>
    %c0_69 = arith.constant 0 : index
    %c0_70 = arith.constant 0 : index
    %195 = vector.load %arg3[%c0_69, %c0_70] : memref<32x128xf32, #tpu.memory_space<vmem>>, vector<32x128xf32>
    %cst_71 = arith.constant dense<0.000000e+00> : vector<8x128xf32>
    %196 = tpu.matmul %191, %195, %cst_71 {dimension_numbers = #tpu.dot_dimension_numbers<[1], [0], [0], [1], [0, 0, 1, 1], [], []>} : vector<8x32xf32>, vector<32x128xf32>, vector<8x128xf32> -> vector<8x128xf32>
    %197 = arith.addf %194, %196 : vector<8x128xf32>
    %198 = arith.negf %197 : vector<8x128xf32>
    %199 = math.exp %198 : vector<8x128xf32>
    %cst_72 = arith.constant 1.000000e+00 : f32
    %200 = vector.broadcast %cst_72 : f32 to vector<8x128xf32>
    %201 = arith.addf %200, %199 : vector<8x128xf32>
    %202 = arith.divf %200, %201 : vector<8x128xf32>
    %cst_73 = arith.constant 2.000000e+00 : f32
    %203 = vector.broadcast %cst_73 : f32 to vector<8x128xf32>
    %204 = arith.mulf %203, %202 : vector<8x128xf32>
    %cst_74 = arith.constant 1.000000e+00 : f32
    %205 = vector.broadcast %cst_74 : f32 to vector<8x128xf32>
    %206 = arith.subf %204, %205 : vector<8x128xf32>
    %207 = arith.select %14, %206, %202 : vector<8x128xi1>, vector<8x128xf32>
    %208 = vector.extract_strided_slice %207 {offsets = [0, 0], sizes = [8, 32], strides = [1, 1]} : vector<8x128xf32> to vector<8x32xf32>
    %209 = vector.extract_strided_slice %207 {offsets = [0, 32], sizes = [8, 32], strides = [1, 1]} : vector<8x128xf32> to vector<8x32xf32>
    %210 = vector.extract_strided_slice %207 {offsets = [0, 64], sizes = [8, 32], strides = [1, 1]} : vector<8x128xf32> to vector<8x32xf32>
    %211 = vector.extract_strided_slice %207 {offsets = [0, 96], sizes = [8, 32], strides = [1, 1]} : vector<8x128xf32> to vector<8x32xf32>
    %212 = arith.mulf %209, %189 : vector<8x32xf32>
    %213 = arith.mulf %208, %210 : vector<8x32xf32>
    %214 = arith.addf %212, %213 : vector<8x32xf32>
    %215 = math.tanh %214 : vector<8x32xf32>
    %216 = arith.mulf %211, %215 : vector<8x32xf32>
    %c8_i32 = arith.constant 8 : i32
    %c0_75 = arith.constant 0 : index
    %c0_76 = arith.constant 0 : index
    %217 = vector.load %arg5[%c0_75, %c0_76] : memref<32x128xf32, #tpu.memory_space<vmem>>, vector<32x128xf32>
    %cst_77 = arith.constant dense<0.000000e+00> : vector<8x128xf32>
    %218 = tpu.matmul %216, %217, %cst_77 {dimension_numbers = #tpu.dot_dimension_numbers<[1], [0], [0], [1], [0, 0, 1, 1], [], []>} : vector<8x32xf32>, vector<32x128xf32>, vector<8x128xf32> -> vector<8x128xf32>
    %c0_78 = arith.constant 0 : index
    %c0_79 = arith.constant 0 : index
    %219 = vector.load %arg6[%c0_78, %c0_79] : memref<1x128xf32, #tpu.memory_space<vmem>>, vector<1x128xf32>
    %220 = vector.broadcast %219 : vector<1x128xf32> to vector<8x128xf32>
    %221 = arith.addf %218, %220 : vector<8x128xf32>
    %cst_80 = arith.constant -1.000000e+00 : f32
    %cst_81 = arith.constant 1.000000e+00 : f32
    %222 = vector.broadcast %cst_80 : f32 to vector<8x128xf32>
    %223 = arith.maximumf %222, %221 : vector<8x128xf32>
    %224 = vector.broadcast %cst_81 : f32 to vector<8x128xf32>
    %225 = arith.minimumf %224, %223 : vector<8x128xf32>
    %c0_82 = arith.constant 0 : index
    %c0_83 = arith.constant 0 : index
    %226 = vector.load %arg7[%c0_82, %c0_83] : memref<8x128xf32, #tpu.memory_space<vmem>>, vector<8x128xf32>
    tpu.vector_store %arg7[%c0_82, %c0_83], %225 {strides = array<i32>} : memref<8x128xf32, #tpu.memory_space<vmem>>, vector<8x128xf32>,
    return
  }
  func.func @transform_0(%arg0: i32) -> (i32, i32, i32) {
    %c0_i32 = arith.constant 0 : i32
    %c0_i32_0 = arith.constant 0 : i32
    %c0_i32_1 = arith.constant 0 : i32
    return %c0_i32, %arg0, %c0_i32_0 : i32, i32, i32
  }
  func.func @transform_1(%arg0: i32) -> (i32, i32) {
    %c0_i32 = arith.constant 0 : i32
    %c0_i32_0 = arith.constant 0 : i32
    %c0_i32_1 = arith.constant 0 : i32
    return %c0_i32, %c0_i32_0 : i32, i32
  }
  func.func @transform_2(%arg0: i32) -> (i32, i32) {
    %c0_i32 = arith.constant 0 : i32
    %c0_i32_0 = arith.constant 0 : i32
    %c0_i32_1 = arith.constant 0 : i32
    return %c0_i32, %c0_i32_0 : i32, i32
  }
  func.func @transform_3(%arg0: i32) -> (i32, i32) {
    %c0_i32 = arith.constant 0 : i32
    %c0_i32_0 = arith.constant 0 : i32
    %c0_i32_1 = arith.constant 0 : i32
    return %c0_i32, %c0_i32_0 : i32, i32
  }
  func.func @transform_4(%arg0: i32) -> (i32, i32) {
    %c0_i32 = arith.constant 0 : i32
    %c0_i32_0 = arith.constant 0 : i32
    %c0_i32_1 = arith.constant 0 : i32
    return %c0_i32, %c0_i32_0 : i32, i32
  }
  func.func @transform_5(%arg0: i32) -> (i32, i32) {
    %c0_i32 = arith.constant 0 : i32
    %c0_i32_0 = arith.constant 0 : i32
    %c0_i32_1 = arith.constant 0 : i32
    return %c0_i32, %c0_i32_0 : i32, i32
  }
  func.func @transform_6(%arg0: i32) -> (i32, i32) {
    %c0_i32 = arith.constant 0 : i32
    %c0_i32_0 = arith.constant 0 : i32
    return %arg0, %c0_i32 : i32, i32
  }
}

</mosaic_0001>

<bundles_post_ra>
// kernel: tpu_custom_call.1
= control target key start
LH: loop header
LB: loop body
LE: loop exit
PB: predicated region body
PF: predicated region fallthrough
CT: control target
= control target key end

     0   :  { %vm65_vm0 = vcmask 1043456   ;;  %v1459_v3 = vmov 0.0|0.0   ;;  %vm40_vm1 = vcmask 31744   ;;  %s1716_s0 = inlined_call_operand.vmem [shape: f32[8,8,4], index: 0, kind: input, shape index: {}]   ;;  %s1717_s1 = inlined_call_operand.vmem [shape: f32[4,128], index: 1, kind: input, shape index: {}]   ;;  %s1718_s2 = inlined_call_operand.vmem [shape: f32[32,128], index: 2, kind: input, shape index: {}]   ;;  %s1719_s3 = inlined_call_operand.vmem [shape: f32[1,128], index: 3, kind: input, shape index: {}]   ;;  %s1720_s4 = inlined_call_operand.vmem [shape: f32[32,128], index: 4, kind: input, shape index: {}]   ;;  %s1721_s5 = inlined_call_operand.vmem [shape: f32[1,128], index: 5, kind: input, shape index: {}]   ;;  %s1722_s6 = inlined_call_operand.hbm [shape: f32[8,128], index: 6, kind: output, shape index: {}]  }
   0x1   :  { %v188_v0 = vld [vmem:[%s1718_s2] sm:$0xff]  ;;  %v189_v1 = vld [vmem:[%s1718_s2 + $0x8] sm:$0xff]  ;;  %1327 = vmatprep.subr.bf16.mxu1 %v1459_v3  ;;  %v190_v7 = vld [vmem:[%s1718_s2 + $0x10] sm:$0xff] }
   0x2   :  { %v32_v2 = vld [vmem:[%s1717_s1] sm:$0xf]  ;;  %v1510_v4 = vpack.c.bf16 %v189_v1, %v188_v0  ;;  %v25_v6 = vld [vmem:[%s1716_s0 + $0x8] sm:$0xff]  ;;  %v191_v8 = vld [vmem:[%s1718_s2 + $0x18] sm:$0xff] }
   0x3   :  { %1214 = vmatprep.subr.msk.mxu0 %vm65_vm0, %v32_v2  ;;  %v24_v5 = vld [vmem:[%s1716_s0] sm:$0xff] }
   0x4   :  { %1215 = vmatpush3.msk.msra.mxu0 %vm65_vm0, %v32_v2  ;;  %1216 = vmatprep.mubr.msk.f32.mxu0 %vm40_vm1, %v24_v5 }
   0x5   :  { %11 = vsyncpa [#allocation4], 0  ;;  %1329 = vmatpush3.bf16.msra.mxu1 %v1510_v4  ;;  %1217 = vmatmul.mubr.msk.f32.vlgmr.msra.gmra.mrb[0].mxu0 %vm40_vm1, %v25_v6  ;;  %v1527_v9 = vpack.c.bf16 %v191_v8, %v190_v7  ;;  %vm1460_vm2 = vmmov 0   ;;  %v1461_v10 = vmov 0.0   ;;  %v1549_v12 = vld [vmem:[%s1719_s3] ss:$0 sm:$0xff]  ;;  %v182_v21 = vlaneseq }
   0x6   :  { %1330 = vmatprep.subr.bf16.mxu1 %v1459_v3  ;;  %1236 = vmatprep.mubr.msk.f32.mxu1 %vm1460_vm2, %v1461_v10  ;;  %s1462_s3 = smov 64   ;;  %s1463_s11 = smov 32   ;;  %vm192_vm6 = vcmask 261120   ;;  %v26_v53 = vld [vmem:[%s1716_s0 + $0x10] sm:$0xff]  ;;  %v27_v54 = vld [vmem:[%s1716_s0 + $0x18] sm:$0xff]  ;;  %v28_v55 = vld [vmem:[%s1716_s0 + $0x20] sm:$0xff] }
   0x7   :  { %1339 = vmatprep.subr.bf16.mxu0 %v1459_v3  ;;  %v183_v22 = vand.u32 127, %v182_v21  ;;  %1219 = vmatprep.mubr.msk.f32.mxu0 %vm40_vm1, %v26_v53  ;;  %v29_v56 = vld [vmem:[%s1716_s0 + $0x28] sm:$0xff]  ;;  %v30_v57 = vld [vmem:[%s1716_s0 + $0x30] sm:$0xff]  ;;  %v31_v58 = vld [vmem:[%s1716_s0 + $0x38] sm:$0xff] }
   0x8   :  { %1341 = vmatpush3.bf16.msra.mxu0 %v1510_v4  ;;  %v1023_v25 = vld [vmem:[%s1720_s4 + $0x10] sm:$0xff] }
   0x9   :  { %1332 = vmatpush3.bf16.msra.mxu1 %v1527_v9  ;;  %1342 = vmatprep.subr.bf16.mxu0 %v1459_v3  ;;  %vm184_vm3 = vcmp.ge.s32.totalorder %v183_v22, 64  ;;  %vm185_vm4 = vcmp.lt.s32.totalorder %v183_v22, 96 }
   0xa   :  { %1333 = vmatprep.subr.bf16.mxu1 %v1459_v3  ;;  %vm1552_vm5 = vmand %vm184_vm3, %vm185_vm4  ;;  %1220 = vmatmul.mubr.msk.f32.gmra.mrb[2].mxu0 %vm40_vm1, %v27_v54 }
   0xb   :  { %1222 = vmatprep.mubr.msk.f32.mxu0 %vm40_vm1, %v28_v55 }
   0xc   :  { %1237 = vmatmul.mubr.f32.vlgmr.msra.gmra.mrb[0].mxu1 %v1461_v10  ;;  %1344 = vmatpush3.bf16.msra.mxu0 %v1527_v9 }
   0xd   :  { %1335 = vmatpush3.bf16.msra.mxu1 %v1510_v4  ;;  %1247 = vmatprep.mubr.msk.f32.mxu1 %vm1460_vm2, %v1461_v10 }
   0xe   :  { %1336 = vmatprep.subr.bf16.mxu1 %v1459_v3  ;;  %1351 = vmatprep.subr.bf16.mxu0 %v1459_v3 }
   0xf   :  { %1223 = vmatmul.mubr.msk.f32.gmra.mrb[4].mxu0 %vm40_vm1, %v29_v56 }
  0x10   :  { %1225 = vmatprep.mubr.msk.f32.mxu0 %vm40_vm1, %v30_v57 }
  0x11   :  { %1338 = vmatpush3.bf16.msra.mxu1 %v1527_v9 }
  0x12   :  { %1345 = vmatprep.subr.bf16.mxu1 %v1459_v3 }
  0x13   :  { %1226 = vmatmul.mubr.msk.f32.gmra.mrb[6].mxu0 %vm40_vm1, %v31_v58 }
  0x14   :  { %1258 = vmatprep.mubr.msk.f32.mxu0 %vm1460_vm2, %v1461_v10 }
  0xd8   :  { %v1218_v11 = vpop.f32.mrb[0].mxu0 }
  0xd9   :  { %v135_v13 = vpop.f32.mrb[1].mxu0  ;;  %v141_v37 = vadd.f32 %v1218_v11, %v1549_v12 }
  0xda   :  { %v136_v14 = vadd.f32 %v1549_v12, %v135_v13 }
  0xdd   :  { %v1221_v62 = vpop.f32.mrb[2].mxu0 }
  0xde   :  { %v145_v63 = vpop.f32.mrb[3].mxu0 }
  0xdf   :  { %v262_v15 = vpop.f32.mrb[0].mxu1  ;;  %v146_v7 = vadd.f32 %v1549_v12, %v145_v63 }
  0xe0   :  { %v266_v16 = vadd.f32 %v262_v15, %v136_v14  ;;  %v1238_v17 = vpop.f32.mrb[1].mxu1 }
  0xe2   :  { %v1134_v18 = vmul.f32 -1.442695, %v266_v16  ;;  %v1602_v0 = vpop.f32.mrb[4].mxu0 }
  0xe3   :  { %v1604_v1 = vpop.f32.mrb[5].mxu0 }
  0xe4   :  { %1387 = vpow2.f32 %v1134_v18 }
  0xe6   :  { %v1606_v2 = vpop.f32.mrb[6].mxu0 }
  0xe7   :  { %v1608_v5 = vpop.f32.mrb[7].mxu0 }
  0xee   :  { %v1388_v19 = vpop.eup %1387 }
  0xef   :  { %v270_v20 = vadd.f32 1.0, %v1388_v19 }
  0xf1   :  { %1389 = vrcp.f32 %v270_v20 }
  0xfb   :  { %v1390_v23 = vpop.eup %1389 }
  0xfc   :  { %v273_v24 = vmul.f32 2.0, %v1390_v23 }
  0xfe   :  { %v1135_v26 = vadd.f32 -1.0, %v273_v24 }
 0x100   :  { %v275_v27 = vsel %vm1552_vm5, %v1135_v26, %v1390_v23 }
 0x101   :  { %278 = vrot.lane.b32.xlu0 %v275_v27, %s1462_s3  ;;  %v276_v30 = vmul.f32 0.0, %v275_v27 }
 0x173   :  { %v279_v28 = vpop.permute.xlu0 %278 }
 0x174   :  { %v281_v29 = vmul.f32 %v279_v28, %v275_v27 }
 0x176   :  { %283 = vrot.lane.b32.xlu0 %v281_v29, %s1463_s11 }
 0x1e8   :  { %v284_v31 = vpop.permute.xlu0 %283 }
 0x1e9   :  { %v286_v32 = vadd.f32 %v284_v31, %v276_v30  ;;  %v151_v31 = vadd.f32 %v1221_v62, %v1549_v12 }
 0x1eb   :  { %1391 = vtanh.f32 %v286_v32 }
 0x1f5   :  { %v1392_v33 = vpop.eup %1391 }
 0x1f6   :  { %289 = vrot.lane.b32.xlu1 %v1392_v33, %s1462_s3 }
 0x268   :  { %v290_v34 = vpop.permute.xlu1 %289 }
 0x269   :  { %v292_v35 = vmul.f32 %v290_v34, %v275_v27 }
 0x26b   :  { %296 = vrot.lane.b32.xlu1 %v292_v35, %s1463_s11 }
 0x2dd   :  { %v297_v36 = vpop.permute.xlu1 %296 }
 0x2de   :  { %1248 = vmatmul.mubr.msk.f32.vlgmr.msra.gmra.mrb[2].mxu1 %vm192_vm6, %v297_v36 }
 0x2df   :  { %1347 = vmatpush3.bf16.msra.mxu1 %v1510_v4  ;;  %1269 = vmatprep.mubr.msk.f32.mxu1 %vm1460_vm2, %v1461_v10 }
 0x2e0   :  { %1348 = vmatprep.subr.bf16.mxu1 %v1459_v3 }
 0x2e3   :  { %1350 = vmatpush3.bf16.msra.mxu1 %v1527_v9 }
 0x2e4   :  { %1357 = vmatprep.subr.bf16.mxu1 %v1459_v3 }
 0x3b1   :  { %v366_v38 = vpop.f32.mrb[2].mxu1 }
 0x3b2   :  { %v370_v39 = vadd.f32 %v366_v38, %v141_v37  ;;  %v1249_v40 = vpop.f32.mrb[3].mxu1 }
 0x3b4   :  { %v1137_v41 = vmul.f32 -1.442695, %v370_v39 }
 0x3b6   :  { %1393 = vpow2.f32 %v1137_v41 }
 0x3c0   :  { %v1394_v42 = vpop.eup %1393 }
 0x3c1   :  { %v374_v43 = vadd.f32 1.0, %v1394_v42 }
 0x3c3   :  { %1395 = vrcp.f32 %v374_v43 }
 0x3cd   :  { %v1396_v44 = vpop.eup %1395 }
 0x3ce   :  { %v377_v45 = vmul.f32 2.0, %v1396_v44 }
 0x3d0   :  { %v1138_v46 = vadd.f32 -1.0, %v377_v45 }
 0x3d2   :  { %v379_v47 = vsel %vm1552_vm5, %v1138_v46, %v1396_v44 }
 0x3d3   :  { %382 = vrot.lane.b32.xlu0 %v379_v47, %s1462_s3  ;;  %v380_v50 = vmul.f32 %v379_v47, %v286_v32 }
 0x445   :  { %v383_v48 = vpop.permute.xlu0 %382 }
 0x446   :  { %v385_v49 = vmul.f32 %v383_v48, %v379_v47 }
 0x448   :  { %387 = vrot.lane.b32.xlu1 %v385_v49, %s1463_s11 }
 0x4ba   :  { %v388_v51 = vpop.permute.xlu1 %387 }
 0x4bb   :  { %v390_v52 = vadd.f32 %v388_v51, %v380_v50  ;;  %v156_v51 = vadd.f32 %v1549_v12, %v1604_v1 }
 0x4bd   :  { %1397 = vtanh.f32 %v390_v52 }
 0x4c7   :  { %v1398_v59 = vpop.eup %1397 }
 0x4c8   :  { %393 = vrot.lane.b32.xlu0 %v1398_v59, %s1462_s3 }
 0x53a   :  { %v394_v60 = vpop.permute.xlu0 %393 }
 0x53b   :  { %v396_v61 = vmul.f32 %v394_v60, %v379_v47 }
 0x53d   :  { %400 = vrot.lane.b32.xlu1 %v396_v61, %s1463_s11 }
 0x5af   :  { %v401_v6 = vpop.permute.xlu1 %400 }
 0x5b0   :  { %1259 = vmatmul.mubr.msk.f32.vlgmr.msra.gmra.mrb[8].mxu0 %vm192_vm6, %v401_v6 }
 0x5b1   :  { %1353 = vmatpush3.bf16.msra.mxu0 %v1510_v4  ;;  %1280 = vmatprep.mubr.msk.f32.mxu0 %vm1460_vm2, %v1461_v10 }
 0x5b2   :  { %1354 = vmatprep.subr.bf16.mxu0 %v1459_v3 }
 0x5b5   :  { %1356 = vmatpush3.bf16.msra.mxu0 %v1527_v9 }
 0x5b6   :  { %1363 = vmatprep.subr.bf16.mxu0 %v1459_v3 }
 0x683   :  { %v470_v8 = vpop.f32.mrb[8].mxu0 }
 0x684   :  { %v474_v11 = vadd.f32 %v470_v8, %v146_v7  ;;  %v1260_v13 = vpop.f32.mrb[9].mxu0 }
 0x686   :  { %v1140_v14 = vmul.f32 -1.442695, %v474_v11 }
 0x688   :  { %1399 = vpow2.f32 %v1140_v14 }
 0x692   :  { %v1400_v15 = vpop.eup %1399 }
 0x693   :  { %v478_v16 = vadd.f32 1.0, %v1400_v15  ;;  %v161_v15 = vadd.f32 %v1602_v0, %v1549_v12 }
 0x695   :  { %1401 = vrcp.f32 %v478_v16 }
 0x69f   :  { %v1402_v17 = vpop.eup %1401 }
 0x6a0   :  { %v481_v18 = vmul.f32 2.0, %v1402_v17 }
 0x6a2   :  { %v1141_v19 = vadd.f32 -1.0, %v481_v18 }
 0x6a4   :  { %v483_v20 = vsel %vm1552_vm5, %v1141_v19, %v1402_v17 }
 0x6a5   :  { %486 = vrot.lane.b32.xlu0 %v483_v20, %s1462_s3  ;;  %v484_v23 = vmul.f32 %v483_v20, %v390_v52 }
 0x717   :  { %v487_v21 = vpop.permute.xlu0 %486 }
 0x718   :  { %v489_v22 = vmul.f32 %v487_v21, %v483_v20 }
 0x71a   :  { %491 = vrot.lane.b32.xlu1 %v489_v22, %s1463_s11 }
 0x78c   :  { %v492_v24 = vpop.permute.xlu1 %491 }
 0x78d   :  { %v494_v26 = vadd.f32 %v492_v24, %v484_v23 }
 0x78f   :  { %1403 = vtanh.f32 %v494_v26 }
 0x799   :  { %v1404_v27 = vpop.eup %1403 }
 0x79a   :  { %497 = vrot.lane.b32.xlu0 %v1404_v27, %s1462_s3 }
 0x80c   :  { %v498_v28 = vpop.permute.xlu0 %497 }
 0x80d   :  { %v500_v29 = vmul.f32 %v498_v28, %v483_v20 }
 0x80f   :  { %504 = vrot.lane.b32.xlu1 %v500_v29, %s1463_s11 }
 0x881   :  { %v505_v30 = vpop.permute.xlu1 %504 }
 0x882   :  { %1270 = vmatmul.mubr.msk.f32.vlgmr.msra.gmra.mrb[4].mxu1 %vm192_vm6, %v505_v30 }
 0x883   :  { %1359 = vmatpush3.bf16.msra.mxu1 %v1510_v4  ;;  %1291 = vmatprep.mubr.msk.f32.mxu1 %vm1460_vm2, %v1461_v10 }
 0x884   :  { %1360 = vmatprep.subr.bf16.mxu1 %v1459_v3 }
 0x887   :  { %1362 = vmatpush3.bf16.msra.mxu1 %v1527_v9 }
 0x888   :  { %1369 = vmatprep.subr.bf16.mxu1 %v1459_v3 }
 0x955   :  { %v574_v32 = vpop.f32.mrb[4].mxu1 }
 0x956   :  { %v578_v33 = vadd.f32 %v574_v32, %v151_v31  ;;  %v1271_v34 = vpop.f32.mrb[5].mxu1 }
 0x958   :  { %v1143_v35 = vmul.f32 -1.442695, %v578_v33  ;;  %v166_v33 = vadd.f32 %v1549_v12, %v1608_v5 }
 0x95a   :  { %1405 = vpow2.f32 %v1143_v35 }
 0x964   :  { %v1406_v36 = vpop.eup %1405 }
 0x965   :  { %v582_v37 = vadd.f32 1.0, %v1406_v36 }
 0x967   :  { %1407 = vrcp.f32 %v582_v37 }
 0x971   :  { %v1408_v38 = vpop.eup %1407 }
 0x972   :  { %v585_v39 = vmul.f32 2.0, %v1408_v38 }
 0x974   :  { %v1144_v40 = vadd.f32 -1.0, %v585_v39 }
 0x976   :  { %v587_v41 = vsel %vm1552_vm5, %v1144_v40, %v1408_v38 }
 0x977   :  { %590 = vrot.lane.b32.xlu0 %v587_v41, %s1462_s3  ;;  %v588_v44 = vmul.f32 %v587_v41, %v494_v26 }
 0x9e9   :  { %v591_v42 = vpop.permute.xlu0 %590 }
 0x9ea   :  { %v593_v43 = vmul.f32 %v591_v42, %v587_v41 }
 0x9ec   :  { %595 = vrot.lane.b32.xlu1 %v593_v43, %s1463_s11 }
 0xa5e   :  { %v596_v45 = vpop.permute.xlu1 %595 }
 0xa5f   :  { %v598_v46 = vadd.f32 %v596_v45, %v588_v44 }
 0xa61   :  { %1409 = vtanh.f32 %v598_v46 }
 0xa6b   :  { %v1410_v47 = vpop.eup %1409 }
 0xa6c   :  { %601 = vrot.lane.b32.xlu0 %v1410_v47, %s1462_s3 }
 0xade   :  { %v602_v48 = vpop.permute.xlu0 %601 }
 0xadf   :  { %v604_v49 = vmul.f32 %v602_v48, %v587_v41 }
 0xae1   :  { %608 = vrot.lane.b32.xlu1 %v604_v49, %s1463_s11 }
 0xb53   :  { %v609_v50 = vpop.permute.xlu1 %608 }
 0xb54   :  { %1281 = vmatmul.mubr.msk.f32.vlgmr.msra.gmra.mrb[10].mxu0 %vm192_vm6, %v609_v50 }
 0xb55   :  { %1365 = vmatpush3.bf16.msra.mxu0 %v1510_v4  ;;  %1302 = vmatprep.mubr.msk.f32.mxu0 %vm1460_vm2, %v1461_v10 }
 0xb56   :  { %1366 = vmatprep.subr.bf16.mxu0 %v1459_v3 }
 0xb59   :  { %1368 = vmatpush3.bf16.msra.mxu0 %v1527_v9 }
 0xb5a   :  { %1375 = vmatprep.subr.bf16.mxu0 %v1459_v3 }
 0xc27   :  { %v678_v52 = vpop.f32.mrb[10].mxu0 }
 0xc28   :  { %v682_v53 = vadd.f32 %v678_v52, %v156_v51  ;;  %v1282_v54 = vpop.f32.mrb[11].mxu0  ;;  %v171_v51 = vadd.f32 %v1606_v2, %v1549_v12 }
 0xc2a   :  { %v1146_v55 = vmul.f32 -1.442695, %v682_v53 }
 0xc2c   :  { %1411 = vpow2.f32 %v1146_v55 }
 0xc36   :  { %v1412_v56 = vpop.eup %1411 }
 0xc37   :  { %v686_v57 = vadd.f32 1.0, %v1412_v56 }
 0xc39   :  { %1413 = vrcp.f32 %v686_v57 }
 0xc43   :  { %v1414_v58 = vpop.eup %1413 }
 0xc44   :  { %v689_v59 = vmul.f32 2.0, %v1414_v58 }
 0xc46   :  { %v1147_v60 = vadd.f32 -1.0, %v689_v59 }
 0xc48   :  { %v691_v61 = vsel %vm1552_vm5, %v1147_v60, %v1414_v58 }
 0xc49   :  { %694 = vrot.lane.b32.xlu0 %v691_v61, %s1462_s3  ;;  %v692_v1 = vmul.f32 %v691_v61, %v598_v46 }
 0xcbb   :  { %v695_v62 = vpop.permute.xlu0 %694 }
 0xcbc   :  { %v697_v63 = vmul.f32 %v695_v62, %v691_v61 }
 0xcbe   :  { %699 = vrot.lane.b32.xlu1 %v697_v63, %s1463_s11 }
 0xd30   :  { %v700_v6 = vpop.permute.xlu1 %699 }
 0xd31   :  { %v702_v7 = vadd.f32 %v700_v6, %v692_v1  ;;  %v1021_v6 = vld [vmem:[%s1720_s4] sm:$0xff] }
 0xd33   :  { %1415 = vtanh.f32 %v702_v7 }
 0xd3d   :  { %v1416_v8 = vpop.eup %1415 }
 0xd3e   :  { %705 = vrot.lane.b32.xlu0 %v1416_v8, %s1462_s3 }
 0xdb0   :  { %v706_v11 = vpop.permute.xlu0 %705 }
 0xdb1   :  { %v708_v13 = vmul.f32 %v706_v11, %v691_v61  ;;  %v1024_v11 = vld [vmem:[%s1720_s4 + $0x18] sm:$0xff] }
 0xdb3   :  { %712 = vrot.lane.b32.xlu1 %v708_v13, %s1463_s11  ;;  %v1379_v13 = vpack.c.bf16 %v1024_v11, %v1023_v25 }
 0xe25   :  { %v713_v14 = vpop.permute.xlu1 %712 }
 0xe26   :  { %1292 = vmatmul.mubr.msk.f32.vlgmr.msra.gmra.mrb[6].mxu1 %vm192_vm6, %v713_v14 }
 0xe27   :  { %1371 = vmatpush3.bf16.msra.mxu1 %v1510_v4  ;;  %1313 = vmatprep.mubr.msk.f32.mxu1 %vm1460_vm2, %v1461_v10 }
 0xe28   :  { %1372 = vmatprep.subr.bf16.mxu1 %v1459_v3 }
 0xe2b   :  { %1374 = vmatpush3.bf16.msra.mxu1 %v1527_v9 }
 0xef9   :  { %v782_v16 = vpop.f32.mrb[6].mxu1 }
 0xefa   :  { %v786_v17 = vadd.f32 %v782_v16, %v161_v15  ;;  %v1293_v18 = vpop.f32.mrb[7].mxu1 }
 0xefb   :  { %v1157_v18 = vld [vmem:[%s1721_s5] ss:$0 sm:$0xff] }
 0xefc   :  { %v1149_v19 = vmul.f32 -1.442695, %v786_v17 }
 0xefe   :  { %1417 = vpow2.f32 %v1149_v19 }
 0xf08   :  { %v1418_v20 = vpop.eup %1417 }
 0xf09   :  { %v790_v21 = vadd.f32 1.0, %v1418_v20 }
 0xf0b   :  { %1419 = vrcp.f32 %v790_v21 }
 0xf15   :  { %v1420_v22 = vpop.eup %1419 }
 0xf16   :  { %v793_v4 = vmul.f32 2.0, %v1420_v22 }
 0xf18   :  { %v1150_v23 = vadd.f32 -1.0, %v793_v4 }
 0xf1a   :  { %v795_v24 = vsel %vm1552_vm5, %v1150_v23, %v1420_v22 }
 0xf1b   :  { %798 = vrot.lane.b32.xlu0 %v795_v24, %s1462_s3  ;;  %v796_v0 = vmul.f32 %v795_v24, %v702_v7  ;;  %v1022_v7 = vld [vmem:[%s1720_s4 + $0x8] sm:$0xff]  ;;  %s1464_s4 = smov [#allocation3]  }
 0xf1c   :  { %v1376_v8 = vpack.c.bf16 %v1022_v7, %v1021_v6  ;;  %s1116_s1 = sshll.u32 %s1464_s4, 4  ;;  %s1117_s1 = int_to_ptr.vmem [resolvable:$true] %s1116_s1 }
 0xf1d   :  { %s1435_s9 = scalar_lea.vmem %s1117_s1, 128  ;;  %p1440_p1 = scmp.lt.s32.totalorder %s1117_s1, %s1117_s1 }
 0xf1e   :  { %p1436_p0 = scmp.ne.s32.totalorder %s1117_s1, %s1435_s9  ;;  %p1441_p2 = scmp.lt.s32.totalorder %s1435_s9, %s1435_s9 }
 0xf20   :  { %p1442_p3 = por %p1441_p2, %p1440_p1 }
 0xf22   :  { %p1443_p4 = pnand %p1442_p3, %p1436_p0 }
 0xf8d   :  { %v799_v9 = vpop.permute.xlu0 %798 }
 0xf8e   :  { %v801_v26 = vmul.f32 %v799_v9, %v795_v24 }
 0xf90   :  { %803 = vrot.lane.b32.xlu1 %v801_v26, %s1463_s11 }
0x1002   :  { %v804_v27 = vpop.permute.xlu1 %803 }
0x1003   :  { %v806_v28 = vadd.f32 %v804_v27, %v796_v0 }
0x1005   :  { %1421 = vtanh.f32 %v806_v28 }
0x100f   :  { %v1422_v29 = vpop.eup %1421 }
0x1010   :  { %809 = vrot.lane.b32.xlu0 %v1422_v29, %s1462_s3 }
0x1082   :  { %v810_v30 = vpop.permute.xlu0 %809 }
0x1083   :  { %v812_v31 = vmul.f32 %v810_v30, %v795_v24 }
0x1085   :  { %816 = vrot.lane.b32.xlu1 %v812_v31, %s1463_s11 }
0x10f7   :  { %v817_v32 = vpop.permute.xlu1 %816 }
0x10f8   :  { %1303 = vmatmul.mubr.msk.f32.vlgmr.msra.gmra.mrb[12].mxu0 %vm192_vm6, %v817_v32 }
0x10f9   :  { %1324 = vmatprep.mubr.msk.f32.mxu0 %vm1460_vm2, %v1461_v10  ;;  %1377 = vmatpush3.bf16.msra.mxu0 %v1376_v8 }
0x10fa   :  { %1378 = vmatprep.subr.bf16.mxu0 %v1459_v3 }
0x10fd   :  { %1380 = vmatpush3.bf16.msra.mxu0 %v1379_v13 }
0x11cb   :  { %v886_v34 = vpop.f32.mrb[12].mxu0 }
0x11cc   :  { %v890_v35 = vadd.f32 %v886_v34, %v166_v33  ;;  %v1304_v36 = vpop.f32.mrb[13].mxu0 }
0x11ce   :  { %v1152_v37 = vmul.f32 -1.442695, %v890_v35 }
0x11d0   :  { %1423 = vpow2.f32 %v1152_v37 }
0x11da   :  { %v1424_v38 = vpop.eup %1423 }
0x11db   :  { %v894_v39 = vadd.f32 1.0, %v1424_v38 }
0x11dd   :  { %1425 = vrcp.f32 %v894_v39 }
0x11e7   :  { %v1426_v40 = vpop.eup %1425 }
0x11e8   :  { %v897_v41 = vmul.f32 2.0, %v1426_v40 }
0x11ea   :  { %v1153_v42 = vadd.f32 -1.0, %v897_v41 }
0x11ec   :  { %v899_v43 = vsel %vm1552_vm5, %v1153_v42, %v1426_v40 }
0x11ed   :  { %902 = vrot.lane.b32.xlu0 %v899_v43, %s1462_s3  ;;  %v900_v5 = vmul.f32 %v899_v43, %v806_v28 }
0x125f   :  { %v903_v10 = vpop.permute.xlu0 %902 }
0x1260   :  { %v905_v44 = vmul.f32 %v903_v10, %v899_v43 }
0x1262   :  { %907 = vrot.lane.b32.xlu1 %v905_v44, %s1463_s11 }
0x12d4   :  { %v908_v45 = vpop.permute.xlu1 %907 }
0x12d5   :  { %v910_v46 = vadd.f32 %v908_v45, %v900_v5 }
0x12d7   :  { %1427 = vtanh.f32 %v910_v46 }
0x12e1   :  { %v1428_v47 = vpop.eup %1427 }
0x12e2   :  { %913 = vrot.lane.b32.xlu0 %v1428_v47, %s1462_s3 }
0x1354   :  { %v914_v48 = vpop.permute.xlu0 %913 }
0x1355   :  { %v916_v49 = vmul.f32 %v914_v48, %v899_v43 }
0x1357   :  { %920 = vrot.lane.b32.xlu1 %v916_v49, %s1463_s11 }
0x13c9   :  { %v921_v50 = vpop.permute.xlu1 %920 }
0x13ca   :  { %1314 = vmatmul.mubr.msk.f32.vlgmr.msra.gmra.mrb[8].mxu1 %vm192_vm6, %v921_v50 }
0x149d   :  { %v990_v52 = vpop.f32.mrb[8].mxu1 }
0x149e   :  { %v994_v53 = vadd.f32 %v990_v52, %v171_v51  ;;  %v1315_v54 = vpop.f32.mrb[9].mxu1 }
0x14a0   :  { %v1155_v55 = vmul.f32 -1.442695, %v994_v53 }
0x14a2   :  { %1429 = vpow2.f32 %v1155_v55 }
0x14ac   :  { %v1430_v56 = vpop.eup %1429 }
0x14ad   :  { %v998_v57 = vadd.f32 1.0, %v1430_v56 }
0x14af   :  { %1431 = vrcp.f32 %v998_v57 }
0x14b9   :  { %v1432_v58 = vpop.eup %1431 }
0x14ba   :  { %v1001_v59 = vmul.f32 2.0, %v1432_v58 }
0x14bc   :  { %v1156_v60 = vadd.f32 -1.0, %v1001_v59 }
0x14be   :  { %v1003_v61 = vsel %vm1552_vm5, %v1156_v60, %v1432_v58 }
0x14bf   :  { %1006 = vrot.lane.b32.xlu0 %v1003_v61, %s1462_s3  ;;  %v1004_v12 = vmul.f32 %v1003_v61, %v910_v46 }
0x1531   :  { %v1007_v62 = vpop.permute.xlu0 %1006 }
0x1532   :  { %v1009_v63 = vmul.f32 %v1007_v62, %v1003_v61 }
0x1534   :  { %1011 = vrot.lane.b32.xlu1 %v1009_v63, %s1463_s11 }
0x15a6   :  { %v1012_v2 = vpop.permute.xlu1 %1011 }
0x15a7   :  { %v1014_v1 = vadd.f32 %v1012_v2, %v1004_v12 }
0x15a9   :  { %1433 = vtanh.f32 %v1014_v1 }
0x15b3   :  { %v1434_v14 = vpop.eup %1433 }
0x15b4   :  { %1017 = vrot.lane.b32.xlu0 %v1434_v14, %s1462_s3 }
0x1626   :  { %v1018_v15 = vpop.permute.xlu0 %1017 }
0x1627   :  { %v1020_v16 = vmul.f32 %v1018_v15, %v1003_v61 }
0x1629   :  { %1033 = vrot.lane.b32.xlu1 %v1020_v16, %s1463_s11 }
0x169b   :  { %v1034_v17 = vpop.permute.xlu1 %1033 }
0x169c   :  { %1325 = vmatmul.mubr.msk.f32.vlgmr.msra.gmra.mrb[14].mxu0 %vm192_vm6, %v1034_v17 }
0x176f   :  { %v1103_v19 = vpop.f32.mrb[14].mxu0 }
0x1770   :  { %v1104_v20 = vadd.f32 %v1157_v18, %v1103_v19  ;;  %v1326_v3 = vpop.f32.mrb[15].mxu0 }
0x1772   :  { %v1159_v21 = vclamps-f32 %v1104_v20, 1.0 }
0x1774   :  { %1109 = vst [vmem:[#allocation3] sm:$0xff] %v1159_v21 }
0x1775   :  { %1446 = shalt.err (!%p1443_p4)
}
0x1776   :  { %s1447_s3 = scalar_lea.hbm %s1722_s6, 128 }
0x1777   :  { %p1448_p5 = scmp.ne.s32.totalorder %s1722_s6, %s1447_s3  ;;  %p1451_p6 = scmp.lt.u32.totalorder %s1447_s3, %s1722_s6 }
0x1779   :  { %p1453_p7 = pnand %p1451_p6, %p1448_p5 }
0x177b   :  { %1456 = shalt.err (!%p1453_p7)
}
0x177c   :  { %1119 = dma.vmem_to_hbm [thread:$0]  %s1117_s1, 128, %s1722_s6, [#allocation4]  }
0x177d   :  { %1457 = dma.done.wait [#allocation4], 128  }
0x177e   :  { %1458 = vsyncadd [#allocation4], 4294967168 }
0x177f   :  { %1123 = vsyncpa [#allocation4], 1 }

</bundles_post_ra>
